<compile_context>
chip_gen: v5e
topology: v5e:2x2
jax: 0.10.0
libtpu: 0.0.40
codegen_flags: <defaults>
</compile_context>

<pallas_src>
import jax
import jax.numpy as jnp
from jax import lax
from jax.experimental import pallas as pl
from jax.experimental.pallas import tpu as pltpu


def _linear_kernel(x_ref, w_ref, b_ref, o_ref):
    # x_ref: (tm, K), w_ref: (N_pad, K), b_ref: (1, N_pad), o_ref: (tm, N_pad)
    acc = lax.dot_general(
        x_ref[...], w_ref[...],
        dimension_numbers=(((1,), (1,)), ((), ())),   # contract K with K (no transpose op)
        preferred_element_type=jnp.float32)
    o_ref[...] = (acc + b_ref[...]).astype(o_ref.dtype)


def _round_up(x, m):
    return ((x + m - 1) // m) * m


def logistic_regressor_forward(x, weight, bias, *, tm=512):
    """x: (B, input_size) f32; weight: (num_classes, input_size); bias: (num_classes,)."""
    B, K = x.shape
    N = weight.shape[0]

    # Lane-dense output: pad num_classes up to a multiple of 128.
    # (In production this padding would be done once at parameter-init time.)
    N_pad = _round_up(N, 128)
    if N_pad != N:
        weight = jnp.pad(weight, ((0, N_pad - N), (0, 0)))
        bias = jnp.pad(bias, (0, N_pad - N))
    b2 = bias.reshape(1, N_pad)

    # Batch tile: >=8 rows (sublane multiple), up to `tm` rows per grid step.
    tm_eff = min(tm, _round_up(B, 8))
    B_pad = _round_up(B, tm_eff)
    if B_pad != B:
        x = jnp.pad(x, ((0, B_pad - B), (0, 0)))

    grid = (B_pad // tm_eff,)

    cost = pl.CostEstimate(
        flops=2 * B_pad * K * N_pad,
        transcendentals=0,
        bytes_accessed=4 * (B_pad * K + N_pad * K + B_pad * N_pad),
    )

    out = pl.pallas_call(
        _linear_kernel,
        out_shape=jax.ShapeDtypeStruct((B_pad, N_pad), x.dtype),
        grid_spec=pltpu.PrefetchScalarGridSpec(
            num_scalar_prefetch=0,
            grid=grid,
            in_specs=[
                pl.BlockSpec((tm_eff, K), lambda i: (i, 0)),     # x tile marches over batch
                pl.BlockSpec((N_pad, K), lambda i: (0, 0)),      # weight resident (no transpose)
                pl.BlockSpec((1, N_pad), lambda i: (0, 0)),      # bias resident
            ],
            out_specs=pl.BlockSpec((tm_eff, N_pad), lambda i: (i, 0)),
        ),
        compiler_params=pltpu.CompilerParams(
            dimension_semantics=("parallel",),   # shard batch tiles across TCs on v7x
        ),
        cost_estimate=cost,
    )(x, weight, b2)

    # Strip batch/class padding (cheap slice, outside the hot kernel).
    return out[:B, :N]


if __name__ == "__main__":
    # Small shapes consistent with the module: batch=8, input_size=32, num_classes=16
    B, input_size, num_classes = 8, 32, 16

    key = jax.random.PRNGKey(0)
    kx, kw, kb = jax.random.split(key, 3)

    x = jax.random.normal(kx, (B, input_size), dtype=jnp.float32)

    # Deterministic init mimicking nn.Linear defaults: U(-1/sqrt(in), 1/sqrt(in))
    bound = 1.0 / jnp.sqrt(jnp.float32(input_size))
    weight = jax.random.uniform(kw, (num_classes, input_size),
                                minval=-bound, maxval=bound, dtype=jnp.float32)
    bias = jax.random.uniform(kb, (num_classes,),
                              minval=-bound, maxval=bound, dtype=jnp.float32)

    out = logistic_regressor_forward(x, weight, bias)
    out = jax.block_until_ready(out)

    # Reference check against plain JAX (same semantics as nn.Linear forward).
    ref = x @ weight.T + bias
    assert out.shape == (B, num_classes)
    assert jnp.allclose(out, ref, atol=1e-5, rtol=1e-5)

    print("KERNEL_OK")
</pallas_src>

<mosaic_0001>
module attributes {stable_mosaic.version = 11 : i64} {
  func.func @_linear_kernel(%arg0: i32, %arg1: memref<8x32xf32, #tpu.memory_space<vmem>>, %arg2: memref<128x32xf32, #tpu.memory_space<vmem>>, %arg3: memref<1x128xf32, #tpu.memory_space<vmem>>, %arg4: memref<8x128xf32, #tpu.memory_space<vmem>>) attributes {dimension_semantics = [#tpu.dimension_semantics<parallel>], iteration_bounds = array<i64: 1>, scalar_prefetch = 0 : i64, scratch_operands = 0 : i64, tpu.core_type = #tpu.core_type<tc>, window_params = [{transform_indices = @transform_0, window_bounds = array<i64: 8, 32>}, {pipeline_mode = #tpu.pipeline_mode<synchronous>, transform_indices = @transform_1, window_bounds = array<i64: 128, 32>}, {pipeline_mode = #tpu.pipeline_mode<synchronous>, transform_indices = @transform_2, window_bounds = array<i64: 1, 128>}, {transform_indices = @transform_3, window_bounds = array<i64: 8, 128>}]} {
    %c0 = arith.constant 0 : index
    %c0_0 = arith.constant 0 : index
    %0 = vector.load %arg1[%c0, %c0_0] : memref<8x32xf32, #tpu.memory_space<vmem>>, vector<8x32xf32>
    %c0_1 = arith.constant 0 : index
    %c0_2 = arith.constant 0 : index
    %1 = vector.load %arg2[%c0_1, %c0_2] : memref<128x32xf32, #tpu.memory_space<vmem>>, vector<128x32xf32>
    %cst = arith.constant dense<0.000000e+00> : vector<8x128xf32>
    %2 = tpu.matmul %0, %1, %cst {dimension_numbers = #tpu.dot_dimension_numbers<[1], [1], [0], [0], [0, 0, 1, 0], [], []>} : vector<8x32xf32>, vector<128x32xf32>, vector<8x128xf32> -> vector<8x128xf32>
    %c0_3 = arith.constant 0 : index
    %c0_4 = arith.constant 0 : index
    %3 = vector.load %arg3[%c0_3, %c0_4] : memref<1x128xf32, #tpu.memory_space<vmem>>, vector<1x128xf32>
    %4 = vector.broadcast %3 : vector<1x128xf32> to vector<8x128xf32>
    %5 = arith.addf %2, %4 : vector<8x128xf32>
    %c0_5 = arith.constant 0 : index
    %c0_6 = arith.constant 0 : index
    %6 = vector.load %arg4[%c0_5, %c0_6] : memref<8x128xf32, #tpu.memory_space<vmem>>, vector<8x128xf32>
    tpu.vector_store %arg4[%c0_5, %c0_6], %5 {strides = array<i32>} : memref<8x128xf32, #tpu.memory_space<vmem>>, vector<8x128xf32>,
    return
  }
  func.func @transform_0(%arg0: i32) -> (i32, i32) {
    %c0_i32 = arith.constant 0 : i32
    %c0_i32_0 = arith.constant 0 : i32
    return %arg0, %c0_i32 : i32, i32
  }
  func.func @transform_1(%arg0: i32) -> (i32, i32) {
    %c0_i32 = arith.constant 0 : i32
    %c0_i32_0 = arith.constant 0 : i32
    %c0_i32_1 = arith.constant 0 : i32
    return %c0_i32, %c0_i32_0 : i32, i32
  }
  func.func @transform_2(%arg0: i32) -> (i32, i32) {
    %c0_i32 = arith.constant 0 : i32
    %c0_i32_0 = arith.constant 0 : i32
    %c0_i32_1 = arith.constant 0 : i32
    return %c0_i32, %c0_i32_0 : i32, i32
  }
  func.func @transform_3(%arg0: i32) -> (i32, i32) {
    %c0_i32 = arith.constant 0 : i32
    %c0_i32_0 = arith.constant 0 : i32
    return %arg0, %c0_i32 : i32, i32
  }
}

</mosaic_0001>

<bundles_post_ra>
// kernel: tpu_custom_call.1
= control target key start
LH: loop header
LB: loop body
LE: loop exit
PB: predicated region body
PF: predicated region fallthrough
CT: control target
= control target key end

     0   :  { %vm36_vm0 = vcmask 261120   ;;  %s265_s0 = inlined_call_operand.vmem [shape: f32[8,32], index: 0, kind: input, shape index: {}]   ;;  %s266_s1 = inlined_call_operand.vmem [shape: f32[128,32], index: 1, kind: input, shape index: {}]   ;;  %s267_s2 = inlined_call_operand.vmem [shape: f32[1,128], index: 2, kind: input, shape index: {}]   ;;  %s268_s3 = inlined_call_operand.hbm [shape: f32[8,128], index: 3, kind: output, shape index: {}]  }
   0x1   :  { %v31_v0 = vld [vmem:[%s266_s1 + $0x78] sm:$0xff]  ;;  %v30_v1 = vld [vmem:[%s266_s1 + $0x70] sm:$0xff] }
   0x2   :  { %125 = vmatpush.xpose.msk.msra.mxu0 %vm36_vm0, %v31_v0 }
   0x3   :  { %8 = vsyncpa [#allocation3], 0  ;;  %v29_v2 = vld [vmem:[%s266_s1 + $0x68] sm:$0xff]  ;;  %v28_v3 = vld [vmem:[%s266_s1 + $0x60] sm:$0xff]  ;;  %s170_s21 = smov [#allocation2]   ;;  %s116_s25 = sshll.u32 %s268_s3, 4  ;;  %s117_s25 = int_to_ptr.hbm [resolvable:$true] %s116_s25 }
   0x4   :  { %v27_v4 = vld [vmem:[%s266_s1 + $0x58] sm:$0xff]  ;;  %v26_v5 = vld [vmem:[%s266_s1 + $0x50] sm:$0xff]  ;;  %v25_v6 = vld [vmem:[%s266_s1 + $0x48] sm:$0xff]  ;;  %s114_s22 = sshll.u32 %s170_s21, 4  ;;  %s115_s22 = int_to_ptr.vmem [resolvable:$true] %s114_s22 }
   0x5   :  { %v24_v7 = vld [vmem:[%s266_s1 + $0x40] sm:$0xff]  ;;  %v23_v8 = vld [vmem:[%s266_s1 + $0x38] sm:$0xff]  ;;  %v22_v9 = vld [vmem:[%s266_s1 + $0x30] sm:$0xff] }
   0x6   :  { %126 = vmatpush.xpose.msk.msra.mxu0 %vm36_vm0, %v30_v1  ;;  %v21_v10 = vld [vmem:[%s266_s1 + $0x28] sm:$0xff]  ;;  %v20_v11 = vld [vmem:[%s266_s1 + $0x20] sm:$0xff]  ;;  %v19_v12 = vld [vmem:[%s266_s1 + $0x18] sm:$0xff] }
   0x7   :  { %v18_v13 = vld [vmem:[%s266_s1 + $0x10] sm:$0xff]  ;;  %v17_v14 = vld [vmem:[%s266_s1 + $0x8] sm:$0xff]  ;;  %v16_v15 = vld [vmem:[%s266_s1] sm:$0xff] }
   0x8   :  { %v15_v16 = vld [vmem:[%s265_s0] sm:$0xff] }
   0x9   :  { %v143_v17 = vld [vmem:[%s267_s2] ss:$0 sm:$0xff] }
   0xa   :  { %127 = vmatpush.xpose.msk.msra.mxu0 %vm36_vm0, %v29_v2 }
   0xe   :  { %128 = vmatpush.xpose.msk.msra.mxu0 %vm36_vm0, %v28_v3 }
  0x12   :  { %129 = vmatpush.xpose.msk.msra.mxu0 %vm36_vm0, %v27_v4 }
  0x16   :  { %130 = vmatpush.xpose.msk.msra.mxu0 %vm36_vm0, %v26_v5 }
  0x1a   :  { %131 = vmatpush.xpose.msk.msra.mxu0 %vm36_vm0, %v25_v6 }
  0x1e   :  { %132 = vmatpush.xpose.msk.msra.mxu0 %vm36_vm0, %v24_v7 }
  0x22   :  { %133 = vmatpush.xpose.msk.msra.mxu0 %vm36_vm0, %v23_v8 }
  0x26   :  { %134 = vmatpush.xpose.msk.msra.mxu0 %vm36_vm0, %v22_v9 }
  0x2a   :  { %135 = vmatpush.xpose.msk.msra.mxu0 %vm36_vm0, %v21_v10 }
  0x2e   :  { %136 = vmatpush.xpose.msk.msra.mxu0 %vm36_vm0, %v20_v11 }
  0x32   :  { %137 = vmatpush.xpose.msk.msra.mxu0 %vm36_vm0, %v19_v12 }
  0x36   :  { %138 = vmatpush.xpose.msk.msra.mxu0 %vm36_vm0, %v18_v13 }
  0x3a   :  { %139 = vmatpush.xpose.msk.msra.mxu0 %vm36_vm0, %v17_v14 }
  0x3e   :  { %140 = vmatpush.xpose.msk.msra.mxu0 %vm36_vm0, %v16_v15 }
  0x41   :  { %141 = vmatmul.msk.f32.vlgmr.msra.gmra.mxu0 %vm36_vm0, %v15_v16 }
  0xbe   :  { %v105_v18 = vpop.f32.mrf.mxu0 }
  0xbf   :  { %v106_v19 = vadd.f32 %v143_v17, %v105_v18 }
  0xc1   :  { %108 = vst [vmem:[#allocation2] sm:$0xff] %v106_v19 }
  0xc2   :  { %119 = dma.vmem_to_hbm [thread:$0]  %s115_s22, 128, %s117_s25, [#allocation3]  }
  0xc3   :  { %168 = dma.done.wait [#allocation3], 128  }
  0xc4   :  { %169 = vsyncadd [#allocation3], 4294967168 }
  0xc5   :  { %124 = vsyncpa [#allocation3], 1 }

</bundles_post_ra>
